<compile_context>
chip_gen: v5e
topology: v5e:2x2
jax: 0.10.0
libtpu: 0.0.40
codegen_flags: <defaults>
</compile_context>

<pallas_src>
import functools

import jax
import jax.numpy as jnp
from jax.experimental import pallas as pl
from jax.experimental.pallas import tpu as pltpu


def _centroid_sums_kernel(x_ref, h_ref, w_ref, d_ref, out_ref, a_ref, ah_ref,
                          *, threshold):
    # x_ref:  (C, TH, WD) input dtype -- one H-tile of one batch element
    # h_ref:  (TH, 1) f32  -- global h coordinate of each row of this tile
    # w_ref:  (1, WD) f32  -- w coordinate of each flattened (w, d) lane
    # d_ref:  (1, WD) f32  -- d coordinate of each flattened (w, d) lane
    # out_ref:(C, 4)  f32  -- per-class [sum, sum*h, sum*w, sum*d]
    # a_ref:  (C, WD) f32 scratch -- lane-resident running sum of x_th
    # ah_ref: (C, WD) f32 scratch -- lane-resident running sum of x_th * h
    bi = pl.program_id(0)
    hi = pl.program_id(1)

    @pl.when((bi == 0) & (hi == 0))
    def _():
        a_ref[...] = jnp.zeros_like(a_ref)
        ah_ref[...] = jnp.zeros_like(ah_ref)

    x = x_ref[...].astype(jnp.float32)                 # (C, TH, WD)
    if threshold is None:                              # centroid == 'orig'
        xt = x
    else:                                              # centroid == 'threshold'
        xt = jnp.where(x > threshold, x, 0.0)
    hc = h_ref[...][None, :, :]                        # (1, TH, 1)

    a_ref[...] += jnp.sum(xt, axis=1)                  # (C, WD)
    ah_ref[...] += jnp.sum(xt * hc, axis=1)            # (C, WD)

    @pl.when((bi == pl.num_programs(0) - 1) & (hi == pl.num_programs(1) - 1))
    def _():
        a = a_ref[...]
        ah = ah_ref[...]
        s0 = jnp.sum(a, axis=1, keepdims=True)                 # (C, 1)
        sy = jnp.sum(ah, axis=1, keepdims=True)                # (C, 1)
        sx = jnp.sum(a * w_ref[...], axis=1, keepdims=True)    # (C, 1)
        sd = jnp.sum(a * d_ref[...], axis=1, keepdims=True)    # (C, 1)
        out_ref[...] = jnp.concatenate([s0, sy, sx, sd], axis=1)


def _class_centroid_sums(x, threshold):
    """Per-class [sum, sum*h, sum*w, sum*d] of (thresholded) x, shape (C, 4)."""
    B, C, H, W, D = x.shape
    wd = W * D
    itemsize = jnp.dtype(x.dtype).itemsize

    # H tile: multiple of 8 sublanes (or full H), sized toward ~4 MiB per block
    # so the pipeline stays at the HBM roofline while double-buffered blocks,
    # coordinate rows and the two (C, WD) accumulators all fit comfortably
    # under every generation's scoped-VMEM limit.
    target_block_bytes = 4 * 1024 * 1024
    row_bytes = C * wd * itemsize
    if H <= 8:
        th_tile = H
    else:
        th_tile = min(H, max(1, target_block_bytes // row_bytes))
        th_tile = max(8, (th_tile // 8) * 8)
    n_h = -(-H // th_tile)
    hp = n_h * th_tile

    x4 = x.reshape(B, C, H, wd)
    if hp != H:
        # zero padding is exact: padded voxels contribute 0 to every sum
        x4 = jnp.pad(x4, ((0, 0), (0, 0), (0, hp - H), (0, 0)))

    hcoord = jnp.arange(hp, dtype=jnp.float32).reshape(hp, 1)
    wcoord = (jnp.arange(wd, dtype=jnp.int32) // D).astype(jnp.float32).reshape(1, wd)
    dcoord = (jnp.arange(wd, dtype=jnp.int32) % D).astype(jnp.float32).reshape(1, wd)

    kernel = functools.partial(_centroid_sums_kernel, threshold=threshold)
    sums = pl.pallas_call(
        kernel,
        out_shape=jax.ShapeDtypeStruct((C, 4), jnp.float32),
        grid=(B, n_h),
        in_specs=[
            pl.BlockSpec((None, C, th_tile, wd), lambda bi, hi: (bi, 0, hi, 0)),
            pl.BlockSpec((th_tile, 1), lambda bi, hi: (hi, 0)),
            pl.BlockSpec((1, wd), lambda bi, hi: (0, 0)),
            pl.BlockSpec((1, wd), lambda bi, hi: (0, 0)),
        ],
        out_specs=pl.BlockSpec((C, 4), lambda bi, hi: (0, 0)),
        scratch_shapes=[
            pltpu.VMEM((C, wd), jnp.float32),
            pltpu.VMEM((C, wd), jnp.float32),
        ],
        compiler_params=pltpu.CompilerParams(
            dimension_semantics=("arbitrary", "arbitrary"),
            vmem_limit_bytes=32 * 1024 * 1024,
        ),
        cost_estimate=pl.CostEstimate(
            flops=4 * B * C * hp * wd,
            transcendentals=0,
            bytes_accessed=B * C * hp * wd * itemsize + (hp + 2 * wd + 4 * C) * 4,
        ),
    )(x4, hcoord, wcoord, dcoord)
    return sums


def graph_spatial_loss_3d(x, gt_sr, n_class=8, centroid="threshold",
                          loss_mask=None):
    """Forward pass of GraphSpatialLoss3D.

    x:     (B, C, H, W, D) class probability maps.
    gt_sr: (5, R) spatial-relation priors: rows (sour, targ, dy_gt, dx_gt, dd_gt)
           (the original module loads these from priors_one.npy and transposes).
    loss_mask is accepted for signature parity and ignored (as in the original).
    """
    del loss_mask
    B, C, H, W, D = x.shape
    if centroid == "threshold":
        thr = 1.0 / float(n_class)
    elif centroid == "orig":
        thr = None
    else:
        # TODO(synk): 'sigmoid' centroid is declared in __init__ but is not
        # implemented by the reference compute_centroids either (it raises).
        raise ValueError("unknown centroid calculation: %r" % (centroid,))

    sums = _class_centroid_sums(x, thr)                     # (C, 4) f32
    s0, sy, sx, sd = sums[:, 0], sums[:, 1], sums[:, 2], sums[:, 3]
    cy = sy / s0          # NaN for empty classes, exactly like the reference
    cx = sx / s0
    cd = sd / s0

    gt_sr = jnp.asarray(gt_sr)
    sour = gt_sr[0].astype(jnp.int32)
    targ = gt_sr[1].astype(jnp.int32)
    dy_gt = gt_sr[2].astype(jnp.float32)
    dx_gt = gt_sr[3].astype(jnp.float32)
    dd_gt = gt_sr[4].astype(jnp.float32)

    diff_y = (cy[sour] - cy[targ] - dy_gt) / float(W)   # / image_dimensions[3]
    diff_x = (cx[sour] - cx[targ] - dx_gt) / float(H)   # / image_dimensions[2]
    diff_d = (cd[sour] - cd[targ] - dd_gt) / float(D)   # / image_dimensions[4]

    def weird_to_num(t):
        return jnp.where(jnp.isfinite(t), t, 0.0)       # NaN/Inf -> 0

    # each per-relation diff is a scalar, so mean(square(.)) == square(.)
    return jnp.sum(weird_to_num(diff_y) ** 2
                   + weird_to_num(diff_x) ** 2
                   + weird_to_num(diff_d) ** 2)


def _reference_graph_spatial_loss_3d(x, gt_sr, n_class=8, centroid="threshold"):
    """Pure-JAX transcription of the PyTorch forward, for verification."""
    x = x.astype(jnp.float32)
    B, C, H, W, D = x.shape
    ys, xs, ds = jnp.meshgrid(jnp.arange(H), jnp.arange(W), jnp.arange(D),
                              indexing="ij")
    coords_y = ys[None, None].astype(jnp.float32)
    coords_x = xs[None, None].astype(jnp.float32)
    coords_d = ds[None, None].astype(jnp.float32)
    if centroid == "threshold":
        bt = jnp.where(x > 1.0 / float(n_class), x, 0.0)
    else:
        bt = x
    denom = jnp.sum(bt, axis=(0, 2, 3, 4))
    cy = jnp.sum(bt * coords_y, axis=(0, 2, 3, 4)) / denom
    cx = jnp.sum(bt * coords_x, axis=(0, 2, 3, 4)) / denom
    cd = jnp.sum(bt * coords_d, axis=(0, 2, 3, 4)) / denom

    gt_sr = jnp.asarray(gt_sr)
    sour = gt_sr[0].astype(jnp.int32)
    targ = gt_sr[1].astype(jnp.int32)
    dy_gt = gt_sr[2].astype(jnp.float32)
    dx_gt = gt_sr[3].astype(jnp.float32)
    dd_gt = gt_sr[4].astype(jnp.float32)

    w2n = lambda t: jnp.where(jnp.isfinite(t), t, 0.0)
    diff_y = (cy[sour] - cy[targ] - dy_gt) / float(W)
    diff_x = (cx[sour] - cx[targ] - dx_gt) / float(H)
    diff_d = (cd[sour] - cd[targ] - dd_gt) / float(D)
    return jnp.sum(w2n(diff_y) ** 2 + w2n(diff_x) ** 2 + w2n(diff_d) ** 2)


if __name__ == "__main__":
    key = jax.random.PRNGKey(0)
    kx, ks, kt, kg = jax.random.split(key, 4)

    n_class = 8
    B, C, H, W, D = 2, n_class, 16, 16, 16
    logits = jax.random.normal(kx, (B, C, H, W, D), dtype=jnp.float32)
    x = jax.nn.softmax(logits, axis=1)                  # probability maps

    # TODO(synk): the original module loads its relation priors from
    # /homedtic/.../priors_one.npy; a deterministic synthetic (5, R) table with
    # the same layout (sour, targ, dy_gt, dx_gt, dd_gt) is built in-script.
    R = 12
    sour = jax.random.randint(ks, (R,), 0, n_class).astype(jnp.float32)
    targ = jax.random.randint(kt, (R,), 0, n_class).astype(jnp.float32)
    deltas = 2.0 * jax.random.normal(kg, (3, R), dtype=jnp.float32)
    gt_sr = jnp.concatenate([sour[None], targ[None], deltas], axis=0)

    loss = jax.block_until_ready(graph_spatial_loss_3d(x, gt_sr, n_class=n_class))
    ref = jax.block_until_ready(
        _reference_graph_spatial_loss_3d(x, gt_sr, n_class=n_class))

    assert jnp.allclose(loss, ref, rtol=1e-4, atol=1e-5), (loss, ref)
    print("KERNEL_OK")
</pallas_src>

<mosaic_0001>
module attributes {stable_mosaic.version = 11 : i64} {
  func.func @_centroid_sums_kernel(%arg0: i32, %arg1: i32, %arg2: memref<1x8x16x256xf32, #tpu.memory_space<vmem>>, %arg3: memref<16x1xf32, #tpu.memory_space<vmem>>, %arg4: memref<1x256xf32, #tpu.memory_space<vmem>>, %arg5: memref<1x256xf32, #tpu.memory_space<vmem>>, %arg6: memref<8x4xf32, #tpu.memory_space<vmem>>, %arg7: memref<8x256xf32, #tpu.memory_space<vmem>>, %arg8: memref<8x256xf32, #tpu.memory_space<vmem>>) attributes {dimension_semantics = [#tpu.dimension_semantics<arbitrary>, #tpu.dimension_semantics<arbitrary>], iteration_bounds = array<i64: 2, 1>, scalar_prefetch = 0 : i64, scratch_operands = 2 : i64, tpu.core_type = #tpu.core_type<tc>, window_params = [{transform_indices = @transform_0, window_bounds = array<i64: 1, 8, 16, 256>}, {transform_indices = @transform_1, window_bounds = array<i64: 16, 1>}, {pipeline_mode = #tpu.pipeline_mode<synchronous>, transform_indices = @transform_2, window_bounds = array<i64: 1, 256>}, {pipeline_mode = #tpu.pipeline_mode<synchronous>, transform_indices = @transform_3, window_bounds = array<i64: 1, 256>}, {pipeline_mode = #tpu.pipeline_mode<synchronous>, transform_indices = @transform_4, window_bounds = array<i64: 8, 4>}]} {
    %c0_i32 = arith.constant 0 : i32
    %0 = arith.cmpi eq, %arg0, %c0_i32 : i32
    %c0_i32_0 = arith.constant 0 : i32
    %1 = arith.cmpi eq, %arg1, %c0_i32_0 : i32
    %2 = arith.andi %0, %1 : i1
    %3 = arith.extui %2 : i1 to i32
    %c0_i32_1 = arith.constant 0 : i32
    %4 = arith.cmpi ne, %3, %c0_i32_1 : i32
    scf.if %4 {
      %cst_20 = arith.constant 0.000000e+00 : f32
      %28 = vector.broadcast %cst_20 : f32 to vector<8x256xf32>
      %c0_21 = arith.constant 0 : index
      %c0_22 = arith.constant 0 : index
      %29 = vector.load %arg7[%c0_21, %c0_22] : memref<8x256xf32, #tpu.memory_space<vmem>>, vector<8x256xf32>
      tpu.vector_store %arg7[%c0_21, %c0_22], %28 {strides = array<i32>} : memref<8x256xf32, #tpu.memory_space<vmem>>, vector<8x256xf32>,
      %cst_23 = arith.constant 0.000000e+00 : f32
      %30 = vector.broadcast %cst_23 : f32 to vector<8x256xf32>
      %c0_24 = arith.constant 0 : index
      %c0_25 = arith.constant 0 : index
      %31 = vector.load %arg8[%c0_24, %c0_25] : memref<8x256xf32, #tpu.memory_space<vmem>>, vector<8x256xf32>
      tpu.vector_store %arg8[%c0_24, %c0_25], %30 {strides = array<i32>} : memref<8x256xf32, #tpu.memory_space<vmem>>, vector<8x256xf32>,
    } else {
    }
    %c0 = arith.constant 0 : index
    %c0_2 = arith.constant 0 : index
    %c0_3 = arith.constant 0 : index
    %c0_4 = arith.constant 0 : index
    %5 = vector.load %arg2[%c0, %c0_2, %c0_3, %c0_4] : memref<1x8x16x256xf32, #tpu.memory_space<vmem>>, vector<1x8x16x256xf32>
    %6 = vector.shape_cast %5 : vector<1x8x16x256xf32> to vector<8x16x256xf32>
    %cst = arith.constant 1.250000e-01 : f32
    %7 = vector.broadcast %cst : f32 to vector<8x16x256xf32>
    %8 = arith.cmpf ogt, %6, %7 : vector<8x16x256xf32>
    %cst_5 = arith.constant 0.000000e+00 : f32
    %9 = vector.broadcast %cst_5 : f32 to vector<8x16x256xf32>
    %10 = arith.select %8, %6, %9 : vector<8x16x256xi1>, vector<8x16x256xf32>
    %c0_6 = arith.constant 0 : index
    %c0_7 = arith.constant 0 : index
    %11 = vector.load %arg3[%c0_6, %c0_7] : memref<16x1xf32, #tpu.memory_space<vmem>>, vector<16x1xf32>
    %12 = vector.shape_cast %11 : vector<16x1xf32> to vector<1x16x1xf32>
    %c0_8 = arith.constant 0 : index
    %c0_9 = arith.constant 0 : index
    %13 = vector.load %arg7[%c0_8, %c0_9] : memref<8x256xf32, #tpu.memory_space<vmem>>, vector<8x256xf32>
    %cst_10 = arith.constant dense<0.000000e+00> : vector<8x256xf32>
    %14 = vector.multi_reduction <add>, %10, %cst_10 [1] : vector<8x16x256xf32> to vector<8x256xf32>
    %15 = arith.addf %13, %14 : vector<8x256xf32>
    %c0_11 = arith.constant 0 : index
    %c0_12 = arith.constant 0 : index
    %16 = vector.load %arg7[%c0_11, %c0_12] : memref<8x256xf32, #tpu.memory_space<vmem>>, vector<8x256xf32>
    tpu.vector_store %arg7[%c0_11, %c0_12], %15 {strides = array<i32>} : memref<8x256xf32, #tpu.memory_space<vmem>>, vector<8x256xf32>,
    %c0_13 = arith.constant 0 : index
    %c0_14 = arith.constant 0 : index
    %17 = vector.load %arg8[%c0_13, %c0_14] : memref<8x256xf32, #tpu.memory_space<vmem>>, vector<8x256xf32>
    %18 = vector.broadcast %12 : vector<1x16x1xf32> to vector<8x16x256xf32>
    %19 = arith.mulf %10, %18 : vector<8x16x256xf32>
    %cst_15 = arith.constant dense<0.000000e+00> : vector<8x256xf32>
    %20 = vector.multi_reduction <add>, %19, %cst_15 [1] : vector<8x16x256xf32> to vector<8x256xf32>
    %21 = arith.addf %17, %20 : vector<8x256xf32>
    %c0_16 = arith.constant 0 : index
    %c0_17 = arith.constant 0 : index
    %22 = vector.load %arg8[%c0_16, %c0_17] : memref<8x256xf32, #tpu.memory_space<vmem>>, vector<8x256xf32>
    tpu.vector_store %arg8[%c0_16, %c0_17], %21 {strides = array<i32>} : memref<8x256xf32, #tpu.memory_space<vmem>>, vector<8x256xf32>,
    %c1_i32 = arith.constant 1 : i32
    %23 = arith.cmpi eq, %arg0, %c1_i32 : i32
    %c0_i32_18 = arith.constant 0 : i32
    %24 = arith.cmpi eq, %arg1, %c0_i32_18 : i32
    %25 = arith.andi %23, %24 : i1
    %26 = arith.extui %25 : i1 to i32
    %c0_i32_19 = arith.constant 0 : i32
    %27 = arith.cmpi ne, %26, %c0_i32_19 : i32
    scf.if %27 {
      %c0_20 = arith.constant 0 : index
      %c0_21 = arith.constant 0 : index
      %28 = vector.load %arg7[%c0_20, %c0_21] : memref<8x256xf32, #tpu.memory_space<vmem>>, vector<8x256xf32>
      %c0_22 = arith.constant 0 : index
      %c0_23 = arith.constant 0 : index
      %29 = vector.load %arg8[%c0_22, %c0_23] : memref<8x256xf32, #tpu.memory_space<vmem>>, vector<8x256xf32>
      %cst_24 = arith.constant dense<0.000000e+00> : vector<8xf32>
      %30 = vector.multi_reduction <add>, %28, %cst_24 [1] : vector<8x256xf32> to vector<8xf32>
      %31 = vector.shape_cast %30 : vector<8xf32> to vector<8x1xf32>
      %cst_25 = arith.constant dense<0.000000e+00> : vector<8xf32>
      %32 = vector.multi_reduction <add>, %29, %cst_25 [1] : vector<8x256xf32> to vector<8xf32>
      %33 = vector.shape_cast %32 : vector<8xf32> to vector<8x1xf32>
      %c0_26 = arith.constant 0 : index
      %c0_27 = arith.constant 0 : index
      %34 = vector.load %arg4[%c0_26, %c0_27] : memref<1x256xf32, #tpu.memory_space<vmem>>, vector<1x256xf32>
      %35 = vector.broadcast %34 : vector<1x256xf32> to vector<8x256xf32>
      %36 = arith.mulf %28, %35 : vector<8x256xf32>
      %cst_28 = arith.constant dense<0.000000e+00> : vector<8xf32>
      %37 = vector.multi_reduction <add>, %36, %cst_28 [1] : vector<8x256xf32> to vector<8xf32>
      %38 = vector.shape_cast %37 : vector<8xf32> to vector<8x1xf32>
      %c0_29 = arith.constant 0 : index
      %c0_30 = arith.constant 0 : index
      %39 = vector.load %arg5[%c0_29, %c0_30] : memref<1x256xf32, #tpu.memory_space<vmem>>, vector<1x256xf32>
      %40 = vector.broadcast %39 : vector<1x256xf32> to vector<8x256xf32>
      %41 = arith.mulf %28, %40 : vector<8x256xf32>
      %cst_31 = arith.constant dense<0.000000e+00> : vector<8xf32>
      %42 = vector.multi_reduction <add>, %41, %cst_31 [1] : vector<8x256xf32> to vector<8xf32>
      %43 = vector.shape_cast %42 : vector<8xf32> to vector<8x1xf32>
      %44 = tpu.concatenate %31, %33, %38, %43 in 1 : vector<8x1xf32>, vector<8x1xf32>, vector<8x1xf32>, vector<8x1xf32> -> vector<8x4xf32>
      %c0_32 = arith.constant 0 : index
      %c0_33 = arith.constant 0 : index
      %45 = vector.load %arg6[%c0_32, %c0_33] : memref<8x4xf32, #tpu.memory_space<vmem>>, vector<8x4xf32>
      tpu.vector_store %arg6[%c0_32, %c0_33], %44 {strides = array<i32>} : memref<8x4xf32, #tpu.memory_space<vmem>>, vector<8x4xf32>,
    } else {
    }
    return
  }
  func.func @transform_0(%arg0: i32, %arg1: i32) -> (i32, i32, i32, i32) {
    %c0_i32 = arith.constant 0 : i32
    %c0_i32_0 = arith.constant 0 : i32
    %c0_i32_1 = arith.constant 0 : i32
    return %arg0, %c0_i32, %arg1, %c0_i32_0 : i32, i32, i32, i32
  }
  func.func @transform_1(%arg0: i32, %arg1: i32) -> (i32, i32) {
    %c0_i32 = arith.constant 0 : i32
    %c0_i32_0 = arith.constant 0 : i32
    return %arg1, %c0_i32 : i32, i32
  }
  func.func @transform_2(%arg0: i32, %arg1: i32) -> (i32, i32) {
    %c0_i32 = arith.constant 0 : i32
    %c0_i32_0 = arith.constant 0 : i32
    %c0_i32_1 = arith.constant 0 : i32
    return %c0_i32, %c0_i32_0 : i32, i32
  }
  func.func @transform_3(%arg0: i32, %arg1: i32) -> (i32, i32) {
    %c0_i32 = arith.constant 0 : i32
    %c0_i32_0 = arith.constant 0 : i32
    %c0_i32_1 = arith.constant 0 : i32
    return %c0_i32, %c0_i32_0 : i32, i32
  }
  func.func @transform_4(%arg0: i32, %arg1: i32) -> (i32, i32) {
    %c0_i32 = arith.constant 0 : i32
    %c0_i32_0 = arith.constant 0 : i32
    %c0_i32_1 = arith.constant 0 : i32
    return %c0_i32, %c0_i32_0 : i32, i32
  }
}

</mosaic_0001>

<bundles_post_ra>
// kernel: tpu_custom_call.1
= control target key start
LH: loop header
LB: loop body
LE: loop exit
PB: predicated region body
PF: predicated region fallthrough
CT: control target
= control target key end

     0   :  { %9 = vsyncpa [#allocation5], 0  ;;  %s1443_s0 = inlined_call_operand.hbm [shape: f32[2,8,16,256], index: 0, kind: input, shape index: {}]   ;;  %s1444_s1 = inlined_call_operand.vmem [shape: f32[16,1], index: 1, kind: input, shape index: {}]   ;;  %s1445_s2 = inlined_call_operand.vmem [shape: f32[1,256], index: 2, kind: input, shape index: {}]   ;;  %s1446_s3 = inlined_call_operand.vmem [shape: f32[1,256], index: 3, kind: input, shape index: {}]   ;;  %s1447_s4 = inlined_call_operand.vmem [shape: f32[8,4], index: 4, kind: output, shape index: {}]  }
   0x1   :  { %11 = vsyncpa [#allocation5 + $0x1], 0  ;;  %s1000_s15 = smov 0   ;;  %s1002_s16 = smov 0  }
   0x2   :  { %s1004_s17 = smov 0   ;;  %s1006_s18 = smov 0  }
   0x3   :  { %s1008_s19 = smov 0   ;;  %s1010_s20 = smov 0  }
   0x4 LB: > { %s813_s21 = sadd.s32 4294967295, %s969_s20   ;;  %s29_s22 = sadd.s32 1, %s965_s19  ;;  %s969_s20 = sphi %s1010_s20, %s17_s20   ;;  %s965_s19 = sphi %s1008_s19, %s1499_s19   ;;  %s961_s18 = sphi %s1006_s18, %s1498_s18   ;;  %s957_s17 = sphi %s1004_s17, %s1497_s17   ;;  %s953_s16 = sphi %s1002_s16, %s1496_s16   ;;  %s949_s15 = sphi %s1000_s15, %s1495_s15  }
   0x5   : > { %p31_p0 = scmp.ge.s32.totalorder %s29_s22, 2  ;;  %s38_s23 = sadd.s32 1, %s957_s17 }
   0x6   : > { %p45_p1 = scmp.ne.s32.totalorder %s957_s17, %s953_s16  ;;  %p46_p2 = scmp.eq.s32.totalorder %s969_s20, 0 }
   0x7   : > { %s1501_s22 = smov (%p31_p0, %s29_s22), 0  ;;  %p51_p4 = scmp.ne.s32.totalorder %s953_s16, %s949_s15 }
   0x8   : > { %p1036_p3 = por %p46_p2, %p45_p1  ;;  %s33_s25 = ssub.s32 %s965_s19, %s1501_s22 }
   0x9   : > { %p52_p5 = scmp.eq.s32.totalorder %s813_s21, 0  ;;  %p36_p6 = scmp.eq.s32.totalorder %s33_s25, 0 }
   0xa   : > { %p835_p8 = scmp.lt.s32.totalorder %s969_s20, 2  ;;  %s179_s28 = sand.u32 1, %s957_s17  }
   0xb   : > { %p1043_p7 = por %p52_p5, %p51_p4  ;;  %s826_s29 = sshll.u32 %s965_s19, 8 }
   0xc   : > { %s1049_s27 = scalar_select %p36_p6, %s957_s17, %s38_s23  }
   0xd   : > { %s817_s30 = sshll.u32 %s179_s28, 8  ;;  %s191_s7 = scalar_lea.hbm %s1443_s0, %s826_s29 }
   0xe   : > { %s192_s8 = sshll.u32 %s191_s7, 4  ;;  %s183_s9 = scalar_lea.vmem [#allocation4], %s817_s30  ;;  %s193_s8 = int_to_ptr.hbm [resolvable:$true] %s192_s8 }
   0xf   : > { %s194_s10 = sshll.u32 %s183_s9, 4  ;;  %p832_p9 = pnand %p835_p8, %p1036_p3  ;;  %s195_s10 = int_to_ptr.vmem [resolvable:$true] %s194_s10 }
  0x10   : > { %p820_p10 = scmp.ge.s32.totalorder %s969_s20, 1  ;;  %p202_p11 = scmp.lt.s32.totalorder %s969_s20, 3 }
  0x11   : > { %s180_s11 = scalar_lea.sflag [#allocation5], %s179_s28  ;;  %s971_s12 = smov 256  }
  0x12   : > { %s972_s13 = smov 16   ;;  %p203_p12 = pnand %p820_p10, %p202_p11 }
  0x13   : > { %834 = dma.hbm_to_vmem [thread:$0]  (!%p832_p9), %s193_s8, 4096, %s195_s10, %s180_s11, %s971_s12, %s971_s12, %s972_s13  }
  0x14   : > { %206 = sbr.rel (%p203_p12) target bundleno = 333 (0x14d), region = 36 }
  0x19   : > { %s208_s14 = sand.u32 1, %s953_s16  }
  0x1a   : > { %s821_s15 = sshll.u32 %s208_s14, 8  ;;  %s209_s21 = scalar_lea.sflag [#allocation5], %s208_s14 }
  0x1b   : > { %s1061_s23 = scalar_lea.vmem [#allocation4], %s821_s15 }
  0x1c   : > { %944 = dma.done.wait (%p1043_p7), %s209_s21, 4096  }
  0x1d   : > { %946 = vsyncadd (%p1043_p7), %s209_s21, 4294963200  ;;  %p245_p13 = scmp.eq.s32.totalorder %s961_s18, 0 }
  0x1e   : > { %v973_v0 = vmov (%p245_p13), 0.0  }
  0x1f   : > { %250 = sbr.rel (!%p245_p13) target bundleno = 36 (0x24), region = 44  ;;  %251 = vst [vmem:[#allocation2] sm:$0xff] (%p245_p13), %v973_v0 }
  0x20   : > { %252 = vst [vmem:[#allocation2 + $0x8] sm:$0xff] (%p245_p13), %v973_v0 }
  0x21   : > { %253 = vst [vmem:[#allocation3 + $0x8] sm:$0xff] (%p245_p13), %v973_v0 }
  0x22   : > { %254 = vst [vmem:[#allocation3] sm:$0xff] (%p245_p13), %v973_v0 }
  0x24 PF: > { %v351_v1 = vld [vmem:[%s1444_s1] sm:$0xff]  ;;  %v974_v2 = vmov 0   ;;  %v352_v3 = vld [vmem:[%s1444_s1 + $0x8] sm:$0xff]  ;;  %p702_p0 = scmp.eq.s32.totalorder %s961_s18, 1  ;;  %v257_v18 = vld [vmem:[%s1061_s23 + $0x10] sm:$0xff] }
  0x25   : > { %888 = vset.pattern.permute.xlu0 %v974_v2  ;;  %v255_v4 = vld [vmem:[%s1061_s23] sm:$0xff]  ;;  %v256_v5 = vld [vmem:[%s1061_s23 + $0x8] sm:$0xff]  ;;  %v258_v19 = vld [vmem:[%s1061_s23 + $0x18] sm:$0xff]  ;;  %vm289_vm14 = vcmp.gt.f32.partialorder %v257_v18, 0.125 }
  0x26   : > { %514 = vperm.xlu0 %888, %v351_v1   ;;  %v259_v6 = vld [vmem:[%s1061_s23 + $0x20] sm:$0xff]  ;;  %v260_v7 = vld [vmem:[%s1061_s23 + $0x28] sm:$0xff]  ;;  %vm287_vm0 = vcmp.gt.f32.partialorder %v255_v4, 0.125  ;;  %vm288_vm1 = vcmp.gt.f32.partialorder %v256_v5, 0.125  ;;  %v261_v20 = vld [vmem:[%s1061_s23 + $0x30] sm:$0xff]  ;;  %vm290_vm15 = vcmp.gt.f32.partialorder %v258_v19, 0.125 }
  0x27   : > { %v263_v8 = vld [vmem:[%s1061_s23 + $0x40] sm:$0xff]  ;;  %v264_v9 = vld [vmem:[%s1061_s23 + $0x48] sm:$0xff]  ;;  %vm291_vm2 = vcmp.gt.f32.partialorder %v259_v6, 0.125  ;;  %vm292_vm3 = vcmp.gt.f32.partialorder %v260_v7, 0.125  ;;  %v1102_v21 = vsel %vm287_vm0, %v255_v4, 0.0  ;;  %v1105_v22 = vsel %vm288_vm1, %v256_v5, 0.0 }
  0x28   : > { %v267_v10 = vld [vmem:[%s1061_s23 + $0x60] sm:$0xff]  ;;  %v268_v11 = vld [vmem:[%s1061_s23 + $0x68] sm:$0xff]  ;;  %vm295_vm4 = vcmp.gt.f32.partialorder %v263_v8, 0.125  ;;  %vm296_vm5 = vcmp.gt.f32.partialorder %v264_v9, 0.125  ;;  %v262_v23 = vld [vmem:[%s1061_s23 + $0x38] sm:$0xff]  ;;  %v1111_v26 = vsel %vm291_vm2, %v259_v6, 0.0 }
  0x29   : > { %v271_v12 = vld [vmem:[%s1061_s23 + $0x80] sm:$0xff]  ;;  %v272_v13 = vld [vmem:[%s1061_s23 + $0x88] sm:$0xff]  ;;  %vm299_vm6 = vcmp.gt.f32.partialorder %v267_v10, 0.125  ;;  %vm300_vm7 = vcmp.gt.f32.partialorder %v268_v11, 0.125  ;;  %v265_v24 = vld [vmem:[%s1061_s23 + $0x50] sm:$0xff]  ;;  %v1114_v27 = vsel %vm292_vm3, %v260_v7, 0.0 }
  0x2a   : > { %v275_v14 = vld [vmem:[%s1061_s23 + $0xa0] sm:$0xff]  ;;  %v1087_v15 = vld [vmem:[%s1061_s23 + $0xa8] sm:$0xff]  ;;  %vm303_vm8 = vcmp.gt.f32.partialorder %v271_v12, 0.125  ;;  %vm304_vm9 = vcmp.gt.f32.partialorder %v272_v13, 0.125  ;;  %v266_v25 = vld [vmem:[%s1061_s23 + $0x58] sm:$0xff]  ;;  %v1117_v28 = vsel %vm295_vm4, %v263_v8, 0.0 }
  0x2b   : > { %v1090_v16 = vld [vmem:[%s1061_s23 + $0xc0] sm:$0xff]  ;;  %v1093_v17 = vld [vmem:[%s1061_s23 + $0xc8] sm:$0xff]  ;;  %vm307_vm10 = vcmp.gt.f32.partialorder %v275_v14, 0.125  ;;  %vm308_vm11 = vcmp.gt.f32.partialorder %v1087_v15, 0.125  ;;  %v269_v29 = vld [vmem:[%s1061_s23 + $0x70] sm:$0xff]  ;;  %v1123_v32 = vsel %vm296_vm5, %v264_v9, 0.0 }
  0x2c   : > { %vm311_vm12 = vcmp.gt.f32.partialorder %v1090_v16, 0.125  ;;  %vm312_vm13 = vcmp.gt.f32.partialorder %v1093_v17, 0.125  ;;  %v270_v30 = vld [vmem:[%s1061_s23 + $0x78] sm:$0xff]  ;;  %v273_v31 = vld [vmem:[%s1061_s23 + $0x90] sm:$0xff]  ;;  %v1126_v33 = vsel %vm299_vm6, %v267_v10, 0.0  ;;  %v1129_v34 = vsel %vm300_vm7, %v268_v11, 0.0 }
  0x2d   : > { %1465 = vst [vmem:[#allocation7_spill] sm:$0xff] %v1129_v34  ;;  %v274_v35 = vld [vmem:[%s1061_s23 + $0x98] sm:$0xff]  ;;  %v277_v36 = vld [vmem:[%s1061_s23 + $0xb0] sm:$0xff]  ;;  %v1135_v38 = vsel %vm303_vm8, %v271_v12, 0.0  ;;  %v1138_v39 = vsel %vm304_vm9, %v272_v13, 0.0  ;;  %v1141_v40 = vsel %vm307_vm10, %v275_v14, 0.0 }
  0x2e   : > { %519 = vperm.xlu0 %888, %v352_v3   ;;  %v278_v37 = vld [vmem:[%s1061_s23 + $0xb8] sm:$0xff]  ;;  %1466 = vst [vmem:[#allocation8_spill] sm:$0xff] %v1141_v40  ;;  %v281_v41 = vld [vmem:[%s1061_s23 + $0xd0] sm:$0xff]  ;;  %vm293_vm0 = vcmp.gt.f32.partialorder %v261_v20, 0.125  ;;  %vm294_vm1 = vcmp.gt.f32.partialorder %v262_v23, 0.125  ;;  %vm297_vm2 = vcmp.gt.f32.partialorder %v265_v24, 0.125 }
  0x2f   : > { %vm298_vm3 = vcmp.gt.f32.partialorder %v266_v25, 0.125  ;;  %vm301_vm4 = vcmp.gt.f32.partialorder %v269_v29, 0.125  ;;  %vm302_vm5 = vcmp.gt.f32.partialorder %v270_v30, 0.125  ;;  %vm305_vm6 = vcmp.gt.f32.partialorder %v273_v31, 0.125  ;;  %v1145_v42 = vld [vmem:[%s1061_s23 + $0xe0] sm:$0xff]  ;;  %v1148_v43 = vld [vmem:[%s1061_s23 + $0xe8] sm:$0xff] }
  0x30   : > { %vm306_vm7 = vcmp.gt.f32.partialorder %v274_v35, 0.125  ;;  %vm309_vm8 = vcmp.gt.f32.partialorder %v277_v36, 0.125  ;;  %vm310_vm9 = vcmp.gt.f32.partialorder %v278_v37, 0.125  ;;  %vm313_vm10 = vcmp.gt.f32.partialorder %v281_v41, 0.125  ;;  %v1157_v47 = vld [vmem:[%s1061_s23 + $0xd8] sm:$0xff]  ;;  %v1160_v48 = vld [vmem:[%s1061_s23 + $0xf0] sm:$0xff] }
  0x31   : > { %v1150_v44 = vsel %vm289_vm14, %v257_v18, 0.0  ;;  %v1152_v45 = vsel %vm290_vm15, %v258_v19, 0.0  ;;  %v1154_v46 = vsel %vm293_vm0, %v261_v20, 0.0  ;;  %v1163_v49 = vsel %vm294_vm1, %v262_v23, 0.0  ;;  %v286_v53 = vld [vmem:[%s1061_s23 + $0xf8] sm:$0xff] }
  0x32   : > { %v1166_v50 = vsel %vm297_vm2, %v265_v24, 0.0  ;;  %v1169_v51 = vsel %vm298_vm3, %v266_v25, 0.0  ;;  %v1172_v52 = vsel %vm301_vm4, %v269_v29, 0.0  ;;  %v1176_v54 = vsel %vm302_vm5, %v270_v30, 0.0 }
  0x33   : > { %1467 = vst [vmem:[#allocation9_spill] sm:$0xff] %v1172_v52  ;;  %v1179_v55 = vsel %vm305_vm6, %v273_v31, 0.0  ;;  %v1182_v56 = vsel %vm306_vm7, %v274_v35, 0.0  ;;  %v1187_v57 = vsel %vm308_vm11, %v1087_v15, 0.0  ;;  %v1190_v58 = vsel %vm309_vm8, %v277_v36, 0.0 }
  0x34   : > { %1468 = vst [vmem:[#allocation10_spill] sm:$0xff] %v1176_v54  ;;  %v1193_v59 = vsel %vm310_vm9, %v278_v37, 0.0  ;;  %v1198_v60 = vsel %vm311_vm12, %v1090_v16, 0.0  ;;  %v1203_v61 = vsel %vm312_vm13, %v1093_v17, 0.0  ;;  %vm314_vm14 = vcmp.gt.f32.partialorder %v1157_v47, 0.125 }
  0x35   : > { %1469 = vst [vmem:[#allocation11_spill] sm:$0xff] %v1187_v57  ;;  %vm315_vm11 = vcmp.gt.f32.partialorder %v1145_v42, 0.125  ;;  %vm316_vm15 = vcmp.gt.f32.partialorder %v1148_v43, 0.125  ;;  %vm317_vm0 = vcmp.gt.f32.partialorder %v1160_v48, 0.125  ;;  %v1210_v62 = vsel %vm313_vm10, %v281_v41, 0.0 }
  0x36   : > { %1470 = vst [vmem:[#allocation12_spill] sm:$0xff] %v1190_v58  ;;  %v355_v63 = vadd.f32 %v1150_v44, %v1102_v21  ;;  %v362_v0 = vadd.f32 %v1152_v45, %v1105_v22  ;;  %v369_v1 = vadd.f32 %v1154_v46, %v1111_v26  ;;  %vm318_vm12 = vcmp.gt.f32.partialorder %v286_v53, 0.125 }
  0x37   : > { %1471 = vst [vmem:[#allocation13_spill] sm:$0xff] %v1193_v59  ;;  %v376_v2 = vadd.f32 %v1163_v49, %v1114_v27  ;;  %v383_v3 = vadd.f32 %v1166_v50, %v1117_v28  ;;  %v390_v4 = vadd.f32 %v1169_v51, %v1123_v32  ;;  %v397_v5 = vadd.f32 %v1172_v52, %v1126_v33 }
  0x38   : > { %1472 = vst [vmem:[#allocation14_spill] sm:$0xff] %v1198_v60  ;;  %v356_v6 = vrot.slane %v355_v63, 4  ;;  %v363_v7 = vrot.slane %v362_v0, 4  ;;  %v370_v8 = vrot.slane %v369_v1, 4  ;;  %v404_v9 = vadd.f32 %v1176_v54, %v1129_v34 }
  0x39   : > { %1473 = vst [vmem:[#allocation15_spill] sm:$0xff] %v1203_v61  ;;  %v377_v10 = vrot.slane %v376_v2, 4  ;;  %v384_v11 = vrot.slane %v383_v3, 4  ;;  %v391_v12 = vrot.slane %v390_v4, 4  ;;  %v398_v13 = vrot.slane %v397_v5, 4 }
  0x3a   : > { %1474 = vst [vmem:[#allocation16_spill] sm:$0xff] %v1210_v62  ;;  %v357_v14 = vadd.f32 %v356_v6, %v355_v63  ;;  %v364_v15 = vadd.f32 %v363_v7, %v362_v0  ;;  %v371_v16 = vadd.f32 %v370_v8, %v369_v1  ;;  %v405_v17 = vrot.slane %v404_v9, 4 }
  0x3b   : > { %v378_v18 = vadd.f32 %v377_v10, %v376_v2  ;;  %v385_v19 = vadd.f32 %v384_v11, %v383_v3  ;;  %v392_v20 = vadd.f32 %v391_v12, %v390_v4  ;;  %v399_v23 = vadd.f32 %v398_v13, %v397_v5 }
  0x3c   : > { %v358_v24 = vrot.slane %v357_v14, 2  ;;  %v365_v25 = vrot.slane %v364_v15, 2  ;;  %v372_v29 = vrot.slane %v371_v16, 2  ;;  %v406_v30 = vadd.f32 %v405_v17, %v404_v9 }
  0x3d   : > { %v379_v31 = vrot.slane %v378_v18, 2  ;;  %v386_v35 = vrot.slane %v385_v19, 2  ;;  %v393_v36 = vrot.slane %v392_v20, 2  ;;  %v400_v37 = vrot.slane %v399_v23, 2 }
  0x3e   : > { %v359_v41 = vadd.f32 %v358_v24, %v357_v14  ;;  %v366_v54 = vadd.f32 %v365_v25, %v364_v15  ;;  %v373_v52 = vadd.f32 %v372_v29, %v371_v16  ;;  %v407_v34 = vrot.slane %v406_v30, 2 }
  0x3f   : > { %v1228_v63 = vadd.f32 %v379_v31, %v378_v18  ;;  %v1230_v0 = vadd.f32 %v386_v35, %v385_v19  ;;  %v1232_v1 = vadd.f32 %v393_v36, %v392_v20  ;;  %v1234_v2 = vadd.f32 %v400_v37, %v399_v23 }
  0x40   : > { %v360_v3 = vrot.slane %v359_v41, 1  ;;  %v367_v4 = vrot.slane %v366_v54, 1  ;;  %v374_v5 = vrot.slane %v373_v52, 1  ;;  %v1236_v6 = vadd.f32 %v407_v34, %v406_v30 }
  0x41   : > { %v1241_v7 = vsel %vm314_vm14, %v1157_v47, 0.0  ;;  %v1246_v8 = vsel %vm315_vm11, %v1145_v42, 0.0  ;;  %v1251_v9 = vsel %vm316_vm15, %v1148_v43, 0.0  ;;  %v1256_v34 = vsel %vm317_vm0, %v1160_v48, 0.0 }
  0x42   : > { %1475 = vst [vmem:[#allocation17_spill] sm:$0xff] %v1241_v7  ;;  %v1259_v10 = vsel %vm318_vm12, %v286_v53, 0.0  ;;  %v381_v47 = vrot.slane %v1228_v63, 1  ;;  %v388_v11 = vrot.slane %v1230_v0, 1  ;;  %v395_v42 = vrot.slane %v1232_v1, 1 }
  0x43   : > { %1476 = vst [vmem:[#allocation18_spill] sm:$0xff] %v1246_v8  ;;  %v1264_v12 = vadd.f32 %v360_v3, %v359_v41  ;;  %v1266_v13 = vadd.f32 %v367_v4, %v366_v54  ;;  %v1268_v43 = vadd.f32 %v374_v5, %v373_v52  ;;  %v402_v14 = vrot.slane %v1234_v2, 1 }
  0x44   : > { %1477 = vst [vmem:[#allocation19_spill] sm:$0xff] %v1251_v9  ;;  %v409_v48 = vrot.slane %v1236_v6, 1  ;;  %v411_v53 = vadd.f32 %v1179_v55, %v1135_v38  ;;  %v418_v15 = vadd.f32 %v1182_v56, %v1138_v39  ;;  %v425_v16 = vadd.f32 %v1190_v58, %v1141_v40 }
  0x45   : > { %1478 = vst [vmem:[#allocation20_spill] sm:$0xff] %v1256_v34  ;;  %v432_v17 = vadd.f32 %v1193_v59, %v1187_v57  ;;  %v439_v52 = vadd.f32 %v1210_v62, %v1198_v60  ;;  %v446_v54 = vadd.f32 %v1241_v7, %v1203_v61  ;;  %v453_v18 = vadd.f32 %v1256_v34, %v1246_v8 }
  0x46   : > { %1479 = vst [vmem:[#allocation21_spill] sm:$0xff] %v1259_v10  ;;  %v412_v19 = vrot.slane %v411_v53, 4  ;;  %v419_v20 = vrot.slane %v418_v15, 4  ;;  %v426_v23 = vrot.slane %v425_v16, 4  ;;  %v460_v24 = vadd.f32 %v1259_v10, %v1251_v9 }
  0x47   : > { %v433_v25 = vrot.slane %v432_v17, 4  ;;  %v440_v29 = vrot.slane %v439_v52, 4  ;;  %v447_v30 = vrot.slane %v446_v54, 4  ;;  %v454_v31 = vrot.slane %v453_v18, 4 }
  0x48   : > { %v413_v35 = vadd.f32 %v412_v19, %v411_v53  ;;  %v420_v36 = vadd.f32 %v419_v20, %v418_v15  ;;  %v427_v37 = vadd.f32 %v426_v23, %v425_v16  ;;  %v461_v41 = vrot.slane %v460_v24, 4 }
  0x49   : > { %v434_v3 = vadd.f32 %v433_v25, %v432_v17  ;;  %v441_v4 = vadd.f32 %v440_v29, %v439_v52  ;;  %v448_v5 = vadd.f32 %v447_v30, %v446_v54  ;;  %v455_v7 = vadd.f32 %v454_v31, %v453_v18 }
  0x4a   : > { %v414_v62 = vrot.slane %v413_v35, 2  ;;  %v421_v34 = vrot.slane %v420_v36, 2  ;;  %v428_v8 = vrot.slane %v427_v37, 2  ;;  %v462_v61 = vadd.f32 %v461_v41, %v460_v24 }
  0x4b   : > { %v435_v60 = vrot.slane %v434_v3, 2  ;;  %v442_v59 = vrot.slane %v441_v4, 2  ;;  %v449_v58 = vrot.slane %v448_v5, 2  ;;  %v456_v10 = vrot.slane %v455_v7, 2 }
  0x4c   : > { %v415_v57 = vadd.f32 %v414_v62, %v413_v35  ;;  %v422_v40 = vadd.f32 %v421_v34, %v420_v36  ;;  %v429_v53 = vadd.f32 %v428_v8, %v427_v37  ;;  %v463_v15 = vrot.slane %v462_v61, 2 }
  0x4d   : > { %v436_v16 = vadd.f32 %v435_v60, %v434_v3  ;;  %v443_v19 = vadd.f32 %v442_v59, %v441_v4  ;;  %v450_v17 = vadd.f32 %v449_v58, %v448_v5  ;;  %v457_v52 = vadd.f32 %v456_v10, %v455_v7 }
  0x4e   : > { %v416_v54 = vrot.slane %v415_v57, 1  ;;  %v423_v18 = vrot.slane %v422_v40, 1  ;;  %v430_v20 = vrot.slane %v429_v53, 1  ;;  %v464_v23 = vadd.f32 %v463_v15, %v462_v61 }
  0x4f   : > { %v382_v24 = vadd.f32 %v381_v47, %v1228_v63  ;;  %v389_v25 = vadd.f32 %v388_v11, %v1230_v0  ;;  %v437_v29 = vrot.slane %v436_v16, 1  ;;  %v444_v30 = vrot.slane %v443_v19, 1 }
  0x50   : > { %v396_v31 = vadd.f32 %v395_v42, %v1232_v1  ;;  %v403_v62 = vadd.f32 %v402_v14, %v1234_v2  ;;  %v410_v8 = vadd.f32 %v409_v48, %v1236_v6  ;;  %v451_v60 = vrot.slane %v450_v17, 1 }
  0x51   : > { %v417_v59 = vadd.f32 %v416_v54, %v415_v57  ;;  %v424_v58 = vadd.f32 %v423_v18, %v422_v40  ;;  %v431_v7 = vadd.f32 %v430_v20, %v429_v53  ;;  %v458_v34 = vrot.slane %v457_v52, 1  ;;  %v1481_v20 = vld [vmem:[#allocation9_spill] sm:$0xff] }
  0x52   : > { %v465_v10 = vrot.slane %v464_v23, 1  ;;  %vm483_vm13 = vcmask 1041409   ;;  %vm485_vm1 = vcmask 1042434   ;;  %vm487_vm2 = vcmask 1043459  }
  0x53   : > { %v438_v61 = vadd.f32 %v437_v29, %v436_v16  ;;  %v445_v63 = vadd.f32 %v444_v30, %v443_v19  ;;  %v484_v0 = vsel %vm483_vm13, %v1268_v43, %v1264_v12  ;;  %vm489_vm3 = vcmask 1044484   ;;  %v353_v43 = vld [vmem:[#allocation2] sm:$0xff] }
  0x54   : > { %v452_v1 = vadd.f32 %v451_v60, %v450_v17  ;;  %v486_v2 = vsel %vm485_vm1, %v389_v25, %v484_v0  ;;  %vm491_vm4 = vcmask 1045509   ;;  %v497_v40 = vsel %vm483_vm13, %v382_v24, %v1266_v13  ;;  %v354_v13 = vld [vmem:[#allocation2 + $0x8] sm:$0xff]  ;;  %v1484_v30 = vld [vmem:[#allocation11_spill] sm:$0xff] }
  0x55   : > { %v459_v57 = vadd.f32 %v458_v34, %v457_v52  ;;  %v488_v6 = vsel %vm487_vm2, %v403_v62, %v486_v2  ;;  %vm493_vm5 = vcmask 1046534   ;;  %v498_v47 = vsel %vm485_vm1, %v396_v31, %v497_v40  ;;  %v1483_v25 = vld [vmem:[#allocation8_spill] sm:$0xff] }
  0x56   : > { %v466_v42 = vadd.f32 %v465_v10, %v464_v23  ;;  %v490_v14 = vsel %vm489_vm3, %v417_v59, %v488_v6  ;;  %vm495_vm6 = vcmask 1047559   ;;  %v499_v12 = vsel %vm487_vm2, %v410_v8, %v498_v47  ;;  %v1485_v62 = vld [vmem:[#allocation12_spill] sm:$0xff]  ;;  %v1486_v8 = vld [vmem:[#allocation13_spill] sm:$0xff] }
  0x57   : > { %v492_v48 = vsel %vm491_vm4, %v431_v7, %v490_v14  ;;  %v500_v35 = vsel %vm489_vm3, %v424_v58, %v499_v12  ;;  %vm739_vm7 = vcmask (%p702_p0), 7168   ;;  %vm741_vm8 = vcmask (%p702_p0), 15360  }
  0x58   : > { %v494_v36 = vsel %vm493_vm5, %v445_v63, %v492_v48  ;;  %v501_v37 = vsel %vm491_vm4, %v438_v61, %v500_v35  ;;  %vm743_vm9 = vcmask (%p702_p0), 23552   ;;  %vm745_vm10 = vcmask (%p702_p0), 31744  }
  0x59   : > { %v496_v3 = vsel %vm495_vm6, %v459_v57, %v494_v36  ;;  %v502_v4 = vsel %vm493_vm5, %v452_v1, %v501_v37 }
  0x5a   : > { %v503_v15 = vsel %vm495_vm6, %v466_v42, %v502_v4  ;;  %v506_v16 = vadd.f32 %v496_v3, %v353_v43 }
  0x5c   : > { %508 = vst [vmem:[#allocation2] sm:$0xff] %v506_v16 }
  0x98   : > { %v1288_v9 = vpop.permute.xlu0 %514 }
  0x99   : > { %v522_v41 = vmul.f32 %v1288_v9, %v1102_v21  ;;  %v523_v5 = vmul.f32 %v1288_v9, %v1105_v22  ;;  %v526_v17 = vmul.f32 %v1288_v9, %v1111_v26  ;;  %v507_v21 = vadd.f32 %v503_v15, %v354_v13 }
  0x9a   : > { %v527_v52 = vmul.f32 %v1288_v9, %v1114_v27  ;;  %v534_v27 = vmul.f32 %v1288_v9, %v1126_v33  ;;  %v542_v29 = vmul.f32 %v1288_v9, %v1483_v25  ;;  %v543_v31 = vmul.f32 %v1288_v9, %v1484_v30  ;;  %v1492_v25 = vld [vmem:[#allocation19_spill] sm:$0xff] }
  0x9b   : > { %509 = vst [vmem:[#allocation2 + $0x8] sm:$0xff] %v507_v21  ;;  %v551_v30 = vmul.f32 %v1288_v9, %v1492_v25 }
  0xa0   : > { %v1303_v11 = vpop.permute.xlu0 %519 }
  0xa1   : > { %v524_v53 = vmul.f32 %v1303_v11, %v1150_v44  ;;  %v525_v19 = vmul.f32 %v1303_v11, %v1152_v45  ;;  %v528_v54 = vmul.f32 %v1303_v11, %v1154_v46  ;;  %v529_v22 = vmul.f32 %v1303_v11, %v1163_v49  ;;  %v1480_v46 = vld [vmem:[#allocation7_spill] sm:$0xff] }
  0xa2   : > { %v530_v44 = vmul.f32 %v1288_v9, %v1117_v28  ;;  %v531_v45 = vmul.f32 %v1288_v9, %v1123_v32  ;;  %v532_v26 = vmul.f32 %v1303_v11, %v1166_v50  ;;  %v533_v18 = vmul.f32 %v1303_v11, %v1169_v51  ;;  %v1482_v28 = vld [vmem:[#allocation10_spill] sm:$0xff] }
  0xa3   : > { %v535_v49 = vmul.f32 %v1288_v9, %v1480_v46  ;;  %v536_v23 = vmul.f32 %v1303_v11, %v1481_v20  ;;  %v537_v24 = vmul.f32 %v1303_v11, %v1482_v28  ;;  %v1348_v32 = vmul.f32 %v1288_v9, %v1135_v38  ;;  %v1489_v46 = vld [vmem:[#allocation16_spill] sm:$0xff]  ;;  %v1490_v20 = vld [vmem:[#allocation17_spill] sm:$0xff]  ;;  %v1491_v28 = vld [vmem:[#allocation18_spill] sm:$0xff] }
  0xa4   : > { %v1352_v50 = vmul.f32 %v1288_v9, %v1138_v39  ;;  %v540_v33 = vmul.f32 %v1303_v11, %v1179_v55  ;;  %v541_v51 = vmul.f32 %v1303_v11, %v1182_v56  ;;  %v544_v38 = vmul.f32 %v1303_v11, %v1485_v62  ;;  %v1493_v62 = vld [vmem:[#allocation20_spill] sm:$0xff] }
  0xa5   : > { %v545_v60 = vmul.f32 %v1303_v11, %v1486_v8  ;;  %v554_v39 = vadd.f32 %v524_v53, %v522_v41  ;;  %v561_v59 = vadd.f32 %v525_v19, %v523_v5  ;;  %v568_v58 = vadd.f32 %v528_v54, %v526_v17 }
  0xa6   : > { %v575_v7 = vadd.f32 %v529_v22, %v527_v52  ;;  %v582_v55 = vadd.f32 %v532_v26, %v530_v44  ;;  %v589_v34 = vadd.f32 %v533_v18, %v531_v45  ;;  %v596_v10 = vadd.f32 %v536_v23, %v534_v27  ;;  %v1487_v45 = vld [vmem:[#allocation14_spill] sm:$0xff]  ;;  %v1488_v18 = vld [vmem:[#allocation15_spill] sm:$0xff] }
  0xa7   : > { %v603_v56 = vadd.f32 %v537_v24, %v535_v49  ;;  %v555_v61 = vrot.slane %v554_v39, 4  ;;  %v562_v63 = vrot.slane %v561_v59, 4  ;;  %v569_v0 = vrot.slane %v568_v58, 4 }
  0xa8   : > { %v576_v1 = vrot.slane %v575_v7, 4  ;;  %v583_v2 = vrot.slane %v582_v55, 4  ;;  %v590_v40 = vrot.slane %v589_v34, 4  ;;  %v597_v57 = vrot.slane %v596_v10, 4 }
  0xa9   : > { %v604_v6 = vrot.slane %v603_v56, 4  ;;  %v556_v47 = vadd.f32 %v555_v61, %v554_v39  ;;  %v563_v42 = vadd.f32 %v562_v63, %v561_v59  ;;  %v570_v14 = vadd.f32 %v569_v0, %v568_v58  ;;  %v1494_v39 = vld [vmem:[#allocation21_spill] sm:$0xff] }
  0xaa   : > { %v577_v12 = vadd.f32 %v576_v1, %v575_v7  ;;  %v584_v43 = vadd.f32 %v583_v2, %v582_v55  ;;  %v591_v48 = vadd.f32 %v590_v40, %v589_v34  ;;  %v598_v35 = vadd.f32 %v597_v57, %v596_v10 }
  0xab   : > { %v605_v13 = vadd.f32 %v604_v6, %v603_v56  ;;  %v557_v36 = vrot.slane %v556_v47, 2  ;;  %v564_v37 = vrot.slane %v563_v42, 2  ;;  %v571_v41 = vrot.slane %v570_v14, 2 }
  0xac   : > { %v578_v3 = vrot.slane %v577_v12, 2  ;;  %v585_v4 = vrot.slane %v584_v43, 2  ;;  %v592_v5 = vrot.slane %v591_v48, 2  ;;  %v599_v53 = vrot.slane %v598_v35, 2 }
  0xad   : > { %v606_v15 = vrot.slane %v605_v13, 2  ;;  %v558_v16 = vadd.f32 %v557_v36, %v556_v47  ;;  %v565_v19 = vadd.f32 %v564_v37, %v563_v42  ;;  %v572_v17 = vadd.f32 %v571_v41, %v570_v14 }
  0xae   : > { %v579_v21 = vadd.f32 %v578_v3, %v577_v12  ;;  %v1366_v52 = vadd.f32 %v585_v4, %v584_v43  ;;  %v1368_v54 = vadd.f32 %v592_v5, %v591_v48  ;;  %v1370_v22 = vadd.f32 %v599_v53, %v598_v35 }
  0xaf   : > { %v1372_v44 = vadd.f32 %v606_v15, %v605_v13  ;;  %v546_v26 = vmul.f32 %v1288_v9, %v1487_v45  ;;  %v547_v27 = vmul.f32 %v1288_v9, %v1488_v18  ;;  %v548_v49 = vmul.f32 %v1303_v11, %v1489_v46 }
  0xb0   : > { %v549_v23 = vmul.f32 %v1303_v11, %v1490_v20  ;;  %v550_v24 = vmul.f32 %v1288_v9, %v1491_v28  ;;  %v552_v8 = vmul.f32 %v1303_v11, %v1493_v62  ;;  %v553_v59 = vmul.f32 %v1303_v11, %v1494_v39 }
  0xb1   : > { %v559_v58 = vrot.slane %v558_v16, 1  ;;  %v566_v7 = vrot.slane %v565_v19, 1  ;;  %v573_v55 = vrot.slane %v572_v17, 1  ;;  %v580_v34 = vrot.slane %v579_v21, 1 }
  0xb2   : > { %v587_v10 = vrot.slane %v1366_v52, 1  ;;  %v594_v56 = vrot.slane %v1368_v54, 1  ;;  %v601_v61 = vrot.slane %v1370_v22, 1  ;;  %v608_v63 = vrot.slane %v1372_v44, 1 }
  0xb3   : > { %v610_v9 = vadd.f32 %v540_v33, %v1348_v32  ;;  %v617_v0 = vadd.f32 %v541_v51, %v1352_v50  ;;  %v624_v1 = vadd.f32 %v544_v38, %v542_v29  ;;  %v631_v2 = vadd.f32 %v545_v60, %v543_v31 }
  0xb4   : > { %v638_v40 = vadd.f32 %v548_v49, %v546_v26  ;;  %v645_v11 = vadd.f32 %v549_v23, %v547_v27  ;;  %v652_v57 = vadd.f32 %v552_v8, %v550_v24  ;;  %v659_v6 = vadd.f32 %v553_v59, %v551_v30 }
  0xb5   : > { %v611_v47 = vrot.slane %v610_v9, 4  ;;  %v618_v42 = vrot.slane %v617_v0, 4  ;;  %v625_v14 = vrot.slane %v624_v1, 4  ;;  %v632_v12 = vrot.slane %v631_v2, 4 }
  0xb6   : > { %v639_v43 = vrot.slane %v638_v40, 4  ;;  %v646_v48 = vrot.slane %v645_v11, 4  ;;  %v653_v35 = vrot.slane %v652_v57, 4  ;;  %v660_v13 = vrot.slane %v659_v6, 4 }
  0xb7   : > { %v612_v36 = vadd.f32 %v611_v47, %v610_v9  ;;  %v619_v37 = vadd.f32 %v618_v42, %v617_v0  ;;  %v626_v41 = vadd.f32 %v625_v14, %v624_v1  ;;  %v633_v32 = vadd.f32 %v632_v12, %v631_v2 }
  0xb8   : > { %v640_v33 = vadd.f32 %v639_v43, %v638_v40  ;;  %v647_v50 = vadd.f32 %v646_v48, %v645_v11  ;;  %v654_v51 = vadd.f32 %v653_v35, %v652_v57  ;;  %v661_v29 = vadd.f32 %v660_v13, %v659_v6  ;;  %v510_v57 = vld [vmem:[#allocation3 + $0x8] sm:$0xff]  ;;  %v511_v6 = vld [vmem:[#allocation3] sm:$0xff] }
  0xb9   : > { %v613_v31 = vrot.slane %v612_v36, 2  ;;  %v620_v38 = vrot.slane %v619_v37, 2  ;;  %v627_v60 = vrot.slane %v626_v41, 2  ;;  %v634_v3 = vrot.slane %v633_v32, 2 }
  0xba   : > { %v641_v4 = vrot.slane %v640_v33, 2  ;;  %v648_v5 = vrot.slane %v647_v50, 2  ;;  %v655_v53 = vrot.slane %v654_v51, 2  ;;  %v662_v15 = vrot.slane %v661_v29, 2 }
  0xbb   : > { %v614_v45 = vadd.f32 %v613_v31, %v612_v36  ;;  %v621_v26 = vadd.f32 %v620_v38, %v619_v37  ;;  %v628_v18 = vadd.f32 %v627_v60, %v626_v41  ;;  %v635_v27 = vadd.f32 %v634_v3, %v633_v32  ;;  %v707_v41 = vld [vmem:[#allocation2] sm:$0xff] (%p702_p0)  ;;  %v708_v32 = vld [vmem:[#allocation2 + $0x8] sm:$0xff] (%p702_p0) }
  0xbc   : > { %v560_v46 = vadd.f32 %v559_v58, %v558_v16  ;;  %v567_v49 = vadd.f32 %v566_v7, %v565_v19  ;;  %v642_v20 = vadd.f32 %v641_v4, %v640_v33  ;;  %v649_v23 = vadd.f32 %v648_v5, %v647_v50  ;;  %v717_v33 = vld [vmem:[%s1445_s2] sm:$0x3] (%p702_p0) }
  0xbd   : > { %v574_v28 = vadd.f32 %v573_v55, %v572_v17  ;;  %v581_v24 = vadd.f32 %v580_v34, %v579_v21  ;;  %v656_v25 = vadd.f32 %v655_v53, %v654_v51  ;;  %v663_v30 = vadd.f32 %v662_v15, %v661_v29  ;;  %v728_v31 = vld [vmem:[%s1446_s3] sm:$0x3] (%p702_p0) }
  0xbe   : > { %v588_v62 = vadd.f32 %v587_v10, %v1366_v52  ;;  %v595_v8 = vadd.f32 %v594_v56, %v1368_v54  ;;  %v615_v39 = vrot.slane %v614_v45, 1  ;;  %v622_v59 = vrot.slane %v621_v26, 1 }
  0xbf   : > { %v629_v9 = vrot.slane %v628_v18, 1  ;;  %v636_v0 = vrot.slane %v635_v27, 1  ;;  %v602_v1 = vadd.f32 %v601_v61, %v1370_v22  ;;  %v609_v2 = vadd.f32 %v608_v63, %v1372_v44 }
  0xc0   : > { %v643_v16 = vrot.slane %v642_v20, 1  ;;  %v650_v19 = vrot.slane %v649_v23, 1  ;;  %v657_v58 = vrot.slane %v656_v25, 1  ;;  %v664_v7 = vrot.slane %v663_v30, 1 }
  0xc1   : > { %v682_v17 = vsel %vm483_vm13, %v574_v28, %v560_v46  ;;  %v689_v21 = vsel %vm483_vm13, %v581_v24, %v567_v49  ;;  %v616_v55 = vadd.f32 %v615_v39, %v614_v45  ;;  %v623_v52 = vadd.f32 %v622_v59, %v621_v26 }
  0xc2   : > { %v683_v54 = vsel %vm485_vm1, %v588_v62, %v682_v17  ;;  %v690_v34 = vsel %vm485_vm1, %v595_v8, %v689_v21  ;;  %v630_v10 = vadd.f32 %v629_v9, %v628_v18  ;;  %v637_v56 = vadd.f32 %v636_v0, %v635_v27 }
  0xc3   : > { %v684_v22 = vsel %vm487_vm2, %v602_v1, %v683_v54  ;;  %v691_v44 = vsel %vm487_vm2, %v609_v2, %v690_v34  ;;  %v644_v61 = vadd.f32 %v643_v16, %v642_v20  ;;  %v651_v63 = vadd.f32 %v650_v19, %v649_v23 }
  0xc4   : > { %v685_v40 = vsel %vm489_vm3, %v616_v55, %v684_v22  ;;  %v692_v11 = vsel %vm489_vm3, %v623_v52, %v691_v44  ;;  %v658_v47 = vadd.f32 %v657_v58, %v656_v25  ;;  %v665_v42 = vadd.f32 %v664_v7, %v663_v30 }
  0xc5   : > { %v686_v14 = vsel %vm491_vm4, %v630_v10, %v685_v40  ;;  %v693_v12 = vsel %vm491_vm4, %v637_v56, %v692_v11  ;;  %v711_v50 = vadd.f32 (%p702_p0), %v708_v32, %v707_v41  ;;  %v719_v51 = vperm.slane (%p702_p0), %v717_v33, 0 }
  0xc6   : > { %v687_v43 = vsel %vm493_vm5, %v644_v61, %v686_v14  ;;  %v694_v48 = vsel %vm493_vm5, %v651_v63, %v693_v12  ;;  %v720_v29 = vperm.slane (%p702_p0), %v717_v33, 1  ;;  %v730_v3 = vperm.slane (%p702_p0), %v728_v31, 0 }
  0xc7   : > { %v688_v35 = vsel %vm495_vm6, %v658_v47, %v687_v43  ;;  %v695_v13 = vsel %vm495_vm6, %v665_v42, %v694_v48  ;;  %706 = sbr.rel (!%p702_p0) target bundleno = 333 (0x14d), region = 48  ;;  %712 = vadd.xlane.f32.xlu0 (%p702_p0), %v711_v50  ;;  %v723_v38 = vmul.f32 (%p702_p0), %v719_v51, %v707_v41  ;;  %v731_v4 = vperm.slane (%p702_p0), %v728_v31, 1 }
  0xc8   : > { %v698_v36 = vadd.f32 %v688_v35, %v510_v57  ;;  %v699_v37 = vadd.f32 %v695_v13, %v511_v6  ;;  %v724_v60 = vmul.f32 (%p702_p0), %v720_v29, %v708_v32  ;;  %v734_v26 = vmul.f32 (%p702_p0), %v730_v3, %v707_v41 }
  0xc9   : > { %v735_v18 = vmul.f32 (%p702_p0), %v731_v4, %v708_v32 }
  0xca   : > { %700 = vst [vmem:[#allocation3 + $0x8] sm:$0xff] %v698_v36  ;;  %v725_v15 = vadd.f32 (%p702_p0), %v724_v60, %v723_v38 }
  0xcb   : > { %701 = vst [vmem:[#allocation3] sm:$0xff] %v699_v37  ;;  %v736_v27 = vadd.f32 (%p702_p0), %v735_v18, %v734_v26 }
  0xcc   : > { %726 = vadd.xlane.f32.xlu1 %v725_v15 }
  0xd1   : > { %v709_v5 = vld [vmem:[#allocation3 + $0x8] sm:$0xff] }
  0xd2   : > { %v710_v53 = vld [vmem:[#allocation3] sm:$0xff] }
  0xd3   : > { %v714_v45 = vadd.f32 %v710_v53, %v709_v5 }
  0xd4   : > { %737 = vadd.xlane.f32.xlu1 %v736_v27 }
  0xd5   : > { %715 = vadd.xlane.f32.xlu0 %v714_v45 }
 0x13a   : > { %v713_v46 = vpop.xlane.xlu0 %712 }
 0x13f   : > { %v727_v49 = vpop.xlane.xlu1 %726 }
 0x147   : > { %v738_v28 = vpop.xlane.xlu1 %737 }
 0x148   : > { %v716_v20 = vpop.xlane.xlu0 %715 }
 0x149   : > { %v740_v23 = vsel %vm739_vm7, %v713_v46, %v716_v20 }
 0x14a   : > { %v742_v24 = vsel %vm741_vm8, %v740_v23, %v727_v49 }
 0x14b   : > { %v744_v25 = vsel %vm743_vm9, %v742_v24, %v738_v28 }
 0x14c   : > { %746 = vst.msk [vmem:[%s1447_s4] sm:$0xff] %vm745_vm10, %v744_v25 }
 0x14d PF: > { %s17_s20 = sadd.s32 1, %s969_s20   ;;  %s1495_s15 = smov %s953_s16 }
 0x14e   : > { %p14_p1 = scmp.ge.s32.totalorder %s17_s20, 4   ;;  %s1496_s16 = smov %s957_s17 }
 0x14f   : > { %s1497_s17 = smov %s1049_s27  ;;  %s1498_s18 = smov %s965_s19 }
 0x150   : > { %s1499_s19 = smov %s1501_s22  ;;  %16 = sbr.rel (!%p14_p1) target bundleno = 4 (0x4), region = 83 }
 0x155   :  { %758 = vsyncpa [#allocation5], 1 }
 0x156   :  { %760 = vsyncpa [#allocation5 + $0x1], 1 }

</bundles_post_ra>
